<compile_context>
chip_gen: v7x
topology: tpu7x:2x2x1
jax: 0.10.0
libtpu: 0.0.40
codegen_flags: <defaults>
</compile_context>

<pallas_src>
import functools
import math

import jax
import jax.numpy as jnp
from jax import lax
from jax.experimental import pallas as pl
from jax.experimental.pallas import tpu as pltpu


# --------------------------------------------------------------------------- #
# VMEM budgeting                                                              #
# --------------------------------------------------------------------------- #

def _vmem_budget_bytes():
    """Generation-aware scoped-VMEM cap: ~75% of per-core physical VMEM.

    v5e/v6e (128 MiB) -> ~96 MiB, v7x (64 MiB) -> ~48 MiB.  Falls back to a
    conservative (v7x-safe) 48 MiB if the hardware query is unavailable.
    """
    try:
        cap = int(pltpu.get_tpu_info().vmem_capacity_bytes)
    except Exception:
        cap = 64 << 20
    return max(int(cap * 0.75), 32 << 20)


def _full_step_bytes(tq, K, D, Dv, in_isz, w_isz, return_weights, per_query_mask):
    """Per-grid-step VMEM footprint of the un-tiled (full-K) path."""
    blocked = (tq * D + K * D + K * Dv + tq * Dv) * in_isz
    if return_weights:
        blocked += tq * K * w_isz
    if per_query_mask:
        blocked += tq * 128 * 4          # lane-padded (tq, 1) int32 block
    blocked *= 2                          # BlockSpec double-buffering
    temps = 8 * tq * K                    # scores + p in f32
    temps += tq * K * in_isz              # p cast for the PV matmul
    temps += 4 * tq * Dv                  # f32 accumulator
    return blocked + temps


def _flash_step_bytes(tq, tk, D, Dv, in_isz):
    """Per-grid-step VMEM footprint of the K-tiled flash path."""
    blocked = 2 * (tq * D + tk * D + tk * Dv + tq * Dv) * in_isz
    scratch = 4 * (2 * tq * 128 + tq * Dv)   # m, l (lane-padded) + acc, f32
    temps = 8 * tq * tk + tq * tk * in_isz + 4 * tq * Dv
    return blocked + scratch + temps


# --------------------------------------------------------------------------- #
# Full-K path (needed for the (B, Q, K) attention-weights output)             #
# --------------------------------------------------------------------------- #

def _attention_body(q_ref, k_ref, v_ref, o_ref, w_ref, *, scale, valid_len,
                    mxu_dtype):
    """One (batch, Q-tile) block against the full key/value sequence.

    valid_len is None, a scalar int32 (per-batch length, from SMEM) or a
    (TQ, 1) int32 array (per-query lengths).
    """
    q = q_ref[0]                                             # (TQ, D)
    k = k_ref[0]                                             # (K, D)
    v = v_ref[0]                                             # (K, Dv)
    if mxu_dtype is not None:
        q = q.astype(mxu_dtype)
        k = k.astype(mxu_dtype)
        v = v.astype(mxu_dtype)
    # Fold 1/sqrt(d) into the (TQ, D) query tile instead of the (TQ, K) scores.
    q = q * jnp.asarray(scale, q.dtype)

    # scores = (Q * scale) @ K^T without a transposed K copy (MXU trans_b path).
    scores = lax.dot_general(q, k, (((1,), (1,)), ((), ())),
                             preferred_element_type=jnp.float32)   # (TQ, K) f32

    if valid_len is not None:
        # (1, K) iota broadcast against scores; no (TQ, K) int32 temporary.
        key_ids = lax.broadcasted_iota(jnp.int32, (1, scores.shape[-1]), 1)
        # d2l masked_softmax convention: -1e6 (valid_len == 0 -> uniform, no NaN).
        scores = jnp.where(key_ids < valid_len, scores, -1e6)

    # Numerically stable softmax statistics in f32.
    m = jnp.max(scores, axis=-1, keepdims=True)              # (TQ, 1)
    p = jnp.exp(scores - m)                                  # (TQ, K)
    denom = jnp.sum(p, axis=-1, keepdims=True)               # (TQ, 1)
    inv = pl.reciprocal(denom, approx=True)                  # EUP slot
    inv = inv * (2.0 - denom * inv)                          # 1 Newton step

    if w_ref is not None:
        w_ref[0] = (p * inv).astype(w_ref.dtype)             # pre-dropout weights

    acc = jnp.dot(p.astype(v.dtype), v, preferred_element_type=jnp.float32)
    o_ref[0] = (acc * inv).astype(o_ref.dtype)


def _kernel_batch_mask(vl_smem, q_ref, k_ref, v_ref, *out_refs, scale, mxu_dtype):
    o_ref = out_refs[0]
    w_ref = out_refs[1] if len(out_refs) > 1 else None
    _attention_body(q_ref, k_ref, v_ref, o_ref, w_ref, scale=scale,
                    valid_len=vl_smem[pl.program_id(0)], mxu_dtype=mxu_dtype)


def _kernel_per_query_mask(q_ref, k_ref, v_ref, vl_ref, *out_refs, scale, mxu_dtype):
    o_ref = out_refs[0]
    w_ref = out_refs[1] if len(out_refs) > 1 else None
    _attention_body(q_ref, k_ref, v_ref, o_ref, w_ref, scale=scale,
                    valid_len=vl_ref[0], mxu_dtype=mxu_dtype)     # (TQ, 1) int32


def _kernel_no_mask(q_ref, k_ref, v_ref, *out_refs, scale, mxu_dtype):
    o_ref = out_refs[0]
    w_ref = out_refs[1] if len(out_refs) > 1 else None
    _attention_body(q_ref, k_ref, v_ref, o_ref, w_ref, scale=scale,
                    valid_len=None, mxu_dtype=mxu_dtype)


# --------------------------------------------------------------------------- #
# K-tiled online-softmax (flash) path: output only, VMEM bounded at TQ x TK   #
# --------------------------------------------------------------------------- #

def _flash_step(q_ref, k_ref, v_ref, o_ref, m_sc, l_sc, acc_sc, *,
                scale, tk, mxu_dtype, valid_len, skip_gate=None):
    ki = pl.program_id(2)

    @pl.when(ki == 0)
    def _():
        m_sc[...] = jnp.full_like(m_sc, -jnp.inf)
        l_sc[...] = jnp.zeros_like(l_sc)
        acc_sc[...] = jnp.zeros_like(acc_sc)

    def compute():
        q = q_ref[0]                                          # (TQ, D)
        k = k_ref[0]                                          # (TK, D)
        v = v_ref[0]                                          # (TK, Dv)
        if mxu_dtype is not None:
            q = q.astype(mxu_dtype)
            k = k.astype(mxu_dtype)
            v = v.astype(mxu_dtype)
        q = q * jnp.asarray(scale, q.dtype)
        s = lax.dot_general(q, k, (((1,), (1,)), ((), ())),
                            preferred_element_type=jnp.float32)   # (TQ, TK) f32
        if valid_len is not None:
            key_ids = ki * tk + lax.broadcasted_iota(jnp.int32, (1, tk), 1)
            s = jnp.where(key_ids < valid_len, s, -1e6)
        m_prev = m_sc[...]
        m_new = jnp.maximum(m_prev, jnp.max(s, axis=-1, keepdims=True))
        alpha = jnp.exp(m_prev - m_new)
        p = jnp.exp(s - m_new)
        l_sc[...] = alpha * l_sc[...] + jnp.sum(p, axis=-1, keepdims=True)
        acc_sc[...] = alpha * acc_sc[...] + jnp.dot(
            p.astype(v.dtype), v, preferred_element_type=jnp.float32)
        m_sc[...] = m_new

    if skip_gate is None:
        compute()
    else:
        pl.when(skip_gate)(compute)

    @pl.when(ki == pl.num_programs(2) - 1)
    def _():
        denom = l_sc[...]
        inv = pl.reciprocal(denom, approx=True)
        inv = inv * (2.0 - denom * inv)
        o_ref[0] = (acc_sc[...] * inv).astype(o_ref.dtype)


def _flash_kernel_no_mask(q_ref, k_ref, v_ref, o_ref, m_sc, l_sc, acc_sc, *,
                          scale, tk, mxu_dtype):
    _flash_step(q_ref, k_ref, v_ref, o_ref, m_sc, l_sc, acc_sc,
                scale=scale, tk=tk, mxu_dtype=mxu_dtype, valid_len=None)


def _flash_kernel_batch_mask(vl_smem, q_ref, k_ref, v_ref, o_ref,
                             m_sc, l_sc, acc_sc, *, scale, tk, mxu_dtype):
    vl = vl_smem[pl.program_id(0)]
    ki = pl.program_id(2)
    # Skip fully-masked K tiles (exact: exp(-1e6 - m) underflows to 0 in f32);
    # valid_len == 0 keeps every tile so the result stays uniform over all K.
    gate = jnp.logical_or(ki * tk < vl, vl == 0)
    _flash_step(q_ref, k_ref, v_ref, o_ref, m_sc, l_sc, acc_sc,
                scale=scale, tk=tk, mxu_dtype=mxu_dtype,
                valid_len=vl, skip_gate=gate)


def _flash_kernel_per_query_mask(q_ref, k_ref, v_ref, vl_ref, o_ref,
                                 m_sc, l_sc, acc_sc, *, scale, tk, mxu_dtype):
    _flash_step(q_ref, k_ref, v_ref, o_ref, m_sc, l_sc, acc_sc,
                scale=scale, tk=tk, mxu_dtype=mxu_dtype,
                valid_len=vl_ref[0])                          # (TQ, 1) int32


# --------------------------------------------------------------------------- #
# pallas_call builders                                                        #
# --------------------------------------------------------------------------- #

def _full_call(queries, keys, values, valid_lens, mask_mode, *, scale, tq,
               mxu_dtype, return_weights, w_dtype, budget, interpret):
    B, Q, D = queries.shape
    K = keys.shape[1]
    Dv = values.shape[-1]
    nq = Q // tq
    grid = (B, nq)
    isz = jnp.dtype(queries.dtype).itemsize

    if mask_mode == "batch":
        q_map = lambda b, qi, vl: (b, qi, 0)
        kv_map = lambda b, qi, vl: (b, 0, 0)
    else:
        q_map = lambda b, qi: (b, qi, 0)
        kv_map = lambda b, qi: (b, 0, 0)

    in_specs = [pl.BlockSpec((1, tq, D), q_map),
                pl.BlockSpec((1, K, D), kv_map),
                pl.BlockSpec((1, K, Dv), kv_map)]

    o_shape = jax.ShapeDtypeStruct((B, Q, Dv), queries.dtype)
    o_spec = pl.BlockSpec((1, tq, Dv), q_map)
    if return_weights:
        out_shape = (o_shape, jax.ShapeDtypeStruct((B, Q, K), w_dtype))
        out_specs = (o_spec, pl.BlockSpec((1, tq, K), q_map))
    else:
        out_shape = o_shape
        out_specs = o_spec

    step = _full_step_bytes(tq, K, D, Dv, isz, jnp.dtype(w_dtype).itemsize,
                            return_weights, mask_mode == "per_query")
    vmem_limit = int(min(max(step + (8 << 20), 32 << 20), budget))
    cparams = pltpu.CompilerParams(
        dimension_semantics=("parallel", "parallel"),
        vmem_limit_bytes=vmem_limit)

    if mask_mode == "batch":
        kernel = functools.partial(_kernel_batch_mask, scale=scale,
                                   mxu_dtype=mxu_dtype)
        gs = pltpu.PrefetchScalarGridSpec(num_scalar_prefetch=1, grid=grid,
                                          in_specs=in_specs, out_specs=out_specs)
        return pl.pallas_call(kernel, grid_spec=gs, out_shape=out_shape,
                              compiler_params=cparams, interpret=interpret,
                              )(valid_lens, queries, keys, values)
    if mask_mode == "per_query":
        # TODO(synk): (B, Q, 1) lane-pads to 128; could be packed lane-dense.
        vl3 = valid_lens[:, :, None]
        in_specs = in_specs + [pl.BlockSpec((1, tq, 1), q_map)]
        kernel = functools.partial(_kernel_per_query_mask, scale=scale,
                                   mxu_dtype=mxu_dtype)
        gs = pltpu.PrefetchScalarGridSpec(num_scalar_prefetch=0, grid=grid,
                                          in_specs=in_specs, out_specs=out_specs)
        return pl.pallas_call(kernel, grid_spec=gs, out_shape=out_shape,
                              compiler_params=cparams, interpret=interpret,
                              )(queries, keys, values, vl3)
    kernel = functools.partial(_kernel_no_mask, scale=scale, mxu_dtype=mxu_dtype)
    gs = pltpu.PrefetchScalarGridSpec(num_scalar_prefetch=0, grid=grid,
                                      in_specs=in_specs, out_specs=out_specs)
    return pl.pallas_call(kernel, grid_spec=gs, out_shape=out_shape,
                          compiler_params=cparams, interpret=interpret,
                          )(queries, keys, values)


def _flash_call(queries, keys, values, valid_lens, mask_mode, *, scale, tq, tk,
                mxu_dtype, budget, interpret):
    B, Q, D = queries.shape
    K = keys.shape[1]
    Dv = values.shape[-1]
    nq, nk = Q // tq, K // tk
    grid = (B, nq, nk)
    isz = jnp.dtype(queries.dtype).itemsize

    if mask_mode == "batch":
        q_map = lambda b, qi, ki, vl: (b, qi, 0)
        o_map = q_map

        def kv_map(b, qi, ki, vl):
            v = vl[b]
            last = jnp.maximum((v + tk - 1) // tk, 1) - 1
            # Clamp the K-tile index for fully-masked tiles: revisited block =>
            # no new DMA.  valid_len == 0 keeps the natural index (full compute).
            return (b, jnp.where(v > 0, jnp.minimum(ki, last), ki), 0)
    else:
        q_map = lambda b, qi, ki: (b, qi, 0)
        o_map = q_map
        kv_map = lambda b, qi, ki: (b, ki, 0)

    in_specs = [pl.BlockSpec((1, tq, D), q_map),
                pl.BlockSpec((1, tk, D), kv_map),
                pl.BlockSpec((1, tk, Dv), kv_map)]
    out_shape = jax.ShapeDtypeStruct((B, Q, Dv), queries.dtype)
    out_specs = pl.BlockSpec((1, tq, Dv), o_map)
    scratch = [pltpu.VMEM((tq, 1), jnp.float32),   # running max m
               pltpu.VMEM((tq, 1), jnp.float32),   # running denom l
               pltpu.VMEM((tq, Dv), jnp.float32)]  # accumulator

    step = _flash_step_bytes(tq, tk, D, Dv, isz)
    vmem_limit = int(min(max(step + (8 << 20), 32 << 20), budget))
    cparams = pltpu.CompilerParams(
        dimension_semantics=("parallel", "parallel", "arbitrary"),
        vmem_limit_bytes=vmem_limit)

    if mask_mode == "batch":
        kernel = functools.partial(_flash_kernel_batch_mask, scale=scale,
                                   tk=tk, mxu_dtype=mxu_dtype)
        gs = pltpu.PrefetchScalarGridSpec(num_scalar_prefetch=1, grid=grid,
                                          in_specs=in_specs, out_specs=out_specs,
                                          scratch_shapes=scratch)
        return pl.pallas_call(kernel, grid_spec=gs, out_shape=out_shape,
                              compiler_params=cparams, interpret=interpret,
                              )(valid_lens, queries, keys, values)
    if mask_mode == "per_query":
        vl3 = valid_lens[:, :, None]
        in_specs = in_specs + [pl.BlockSpec((1, tq, 1), q_map)]
        kernel = functools.partial(_flash_kernel_per_query_mask, scale=scale,
                                   tk=tk, mxu_dtype=mxu_dtype)
        gs = pltpu.PrefetchScalarGridSpec(num_scalar_prefetch=0, grid=grid,
                                          in_specs=in_specs, out_specs=out_specs,
                                          scratch_shapes=scratch)
        return pl.pallas_call(kernel, grid_spec=gs, out_shape=out_shape,
                              compiler_params=cparams, interpret=interpret,
                              )(queries, keys, values, vl3)
    kernel = functools.partial(_flash_kernel_no_mask, scale=scale, tk=tk,
                               mxu_dtype=mxu_dtype)
    gs = pltpu.PrefetchScalarGridSpec(num_scalar_prefetch=0, grid=grid,
                                      in_specs=in_specs, out_specs=out_specs,
                                      scratch_shapes=scratch)
    return pl.pallas_call(kernel, grid_spec=gs, out_shape=out_shape,
                          compiler_params=cparams, interpret=interpret,
                          )(queries, keys, values)


# --------------------------------------------------------------------------- #
# Public wrapper                                                              #
# --------------------------------------------------------------------------- #

def dot_product_attention(queries, keys, values, valid_lens=None, *,
                          return_weights=True, tq=None, tk=None,
                          mxu_dtype=None, weights_dtype=None, interpret=False):
    """Pallas equivalent of DotProductAttention.forward (eval mode).

    Returns (output, attention_weights) if return_weights else output.
      output            : (B, Q, Dv)  in queries.dtype
      attention_weights : (B, Q, K)   in weights_dtype (default queries.dtype)

    mxu_dtype=jnp.bfloat16 casts the MXU operands (Q/K/V) while keeping f32
    softmax statistics/accumulation (faster on v6e/v7x, slightly less accurate).
    tk enables the K-tiled flash path (return_weights=False only).
    """
    B, Q, D = queries.shape
    Bk, K, Dk = keys.shape
    Bv, Kv, Dv = values.shape
    assert Bk == B and Bv == B and Dk == D and Kv == K

    scale = 1.0 / math.sqrt(D)
    isz = jnp.dtype(queries.dtype).itemsize
    w_dtype = jnp.dtype(weights_dtype) if weights_dtype is not None \
        else jnp.dtype(queries.dtype)

    # ---- Q tile size: multiple of 8 sublanes, ideally 128/256 rows. ----------
    if tq is None:
        tq = 256 if Q % 256 == 0 else (128 if Q % 128 == 0 else Q)
    assert Q % tq == 0, "Q must be divisible by the Q tile size"

    # ---- mask mode ------------------------------------------------------------
    if valid_lens is None:
        mask_mode = "none"
    else:
        valid_lens = jnp.asarray(valid_lens, dtype=jnp.int32)
        mask_mode = "batch" if valid_lens.ndim == 1 else "per_query"

    budget = _vmem_budget_bytes()

    # ---- flash (K-tiled) path selection: output-only, large K or explicit tk --
    use_flash = False
    if not return_weights:
        if tk is not None:
            assert K % tk == 0, "K must be divisible by the K tile size"
            use_flash = tk < K
        else:
            full_bytes = _full_step_bytes(tq, K, D, Dv, isz, w_dtype.itemsize,
                                          False, mask_mode == "per_query")
            if full_bytes + (8 << 20) > budget // 3 and K % 128 == 0:
                tk = 256 if K % 256 == 0 else 128
                use_flash = tk < K
    # TODO(synk): a two-pass flash variant could also emit weights for huge K.

    if use_flash:
        return _flash_call(queries, keys, values, valid_lens, mask_mode,
                           scale=scale, tq=tq, tk=tk, mxu_dtype=mxu_dtype,
                           budget=budget, interpret=interpret)

    result = _full_call(queries, keys, values, valid_lens, mask_mode,
                        scale=scale, tq=tq, mxu_dtype=mxu_dtype,
                        return_weights=return_weights, w_dtype=w_dtype,
                        budget=budget, interpret=interpret)
    if return_weights:
        return result[0], result[1]
    return result


# --------------------------------------------------------------------------- #
# Pure-JAX reference and self-test                                            #
# --------------------------------------------------------------------------- #

def _reference(queries, keys, values, valid_lens=None):
    """Pure-JAX reference matching the PyTorch module (eval mode)."""
    d = queries.shape[-1]
    scores = jnp.einsum("bqd,bkd->bqk", queries, keys) / math.sqrt(d)
    B, Q, K = scores.shape
    if valid_lens is not None:
        vl = jnp.asarray(valid_lens, dtype=jnp.int32)
        if vl.ndim == 1:
            vl = jnp.broadcast_to(vl[:, None], (B, Q))
        key_ids = jnp.arange(K)[None, None, :]
        scores = jnp.where(key_ids < vl[:, :, None], scores, -1e6)
    w = jax.nn.softmax(scores, axis=-1)
    return jnp.einsum("bqk,bkv->bqv", w, values), w


if __name__ == "__main__":
    # ---- small shapes consistent with the module (bsz=2, seq=8, hidden=32) ----
    B, Q, K, D, Dv = 2, 8, 8, 32, 32
    key = jax.random.PRNGKey(0)
    kq, kk, kv = jax.random.split(key, 3)
    queries = jax.random.normal(kq, (B, Q, D), dtype=jnp.float32)
    keys = jax.random.normal(kk, (B, K, D), dtype=jnp.float32)
    values = jax.random.normal(kv, (B, K, Dv), dtype=jnp.float32)
    valid_lens = jnp.array([3, 6], dtype=jnp.int32)             # (bsz,)
    ref_out, ref_w = _reference(queries, keys, values, valid_lens)

    # 1) per-batch valid_lens (common d2l case) — scalar-prefetch masked path.
    out, attn_w = dot_product_attention(queries, keys, values, valid_lens)
    out, attn_w = jax.block_until_ready(out), jax.block_until_ready(attn_w)
    assert out.shape == (B, Q, Dv) and attn_w.shape == (B, Q, K)
    assert jnp.allclose(out, ref_out, atol=1e-4, rtol=1e-4)
    assert jnp.allclose(attn_w, ref_w, atol=1e-4, rtol=1e-4)

    # 2) per-query valid_lens (B, Q).
    vl_q = jnp.broadcast_to(valid_lens[:, None], (B, Q))
    out2, attn_w2 = dot_product_attention(queries, keys, values, vl_q)
    out2 = jax.block_until_ready(out2)
    assert jnp.allclose(out2, ref_out, atol=1e-4, rtol=1e-4)
    assert jnp.allclose(attn_w2, ref_w, atol=1e-4, rtol=1e-4)

    # 3) no mask, output-only (weights writeback dropped entirely).
    out3 = dot_product_attention(queries, keys, values, None,
                                 return_weights=False)
    out3 = jax.block_until_ready(out3)
    ref_out3, _ = _reference(queries, keys, values, None)
    assert jnp.allclose(out3, ref_out3, atol=1e-4, rtol=1e-4)

    # 4) bf16 MXU operands (precision flag) — looser tolerance.
    out4 = dot_product_attention(queries, keys, values, valid_lens,
                                 return_weights=False, mxu_dtype=jnp.bfloat16)
    out4 = jax.block_until_ready(out4)
    assert jnp.allclose(out4, ref_out, atol=3e-2, rtol=3e-2)

    # ---- K-tiled flash path (still small, but enough to tile K) ---------------
    Bf, Qf, Kf, Df, Dvf = 2, 128, 256, 32, 32
    fq, fk, fv = jax.random.split(jax.random.PRNGKey(0), 3)
    qf = jax.random.normal(fq, (Bf, Qf, Df), dtype=jnp.float32)
    kf = jax.random.normal(fk, (Bf, Kf, Df), dtype=jnp.float32)
    vf = jax.random.normal(fv, (Bf, Kf, Dvf), dtype=jnp.float32)
    vlf = jnp.array([100, 256], dtype=jnp.int32)
    ref_f, _ = _reference(qf, kf, vf, vlf)
    ref_f_nomask, _ = _reference(qf, kf, vf, None)

    # 5) flash, batch mask (length-bounded compute/DMA + skip gating).
    out5 = dot_product_attention(qf, kf, vf, vlf, return_weights=False, tk=128)
    out5 = jax.block_until_ready(out5)
    assert jnp.allclose(out5, ref_f, atol=5e-4, rtol=5e-4)

    # 6) flash, no mask.
    out6 = dot_product_attention(qf, kf, vf, None, return_weights=False, tk=128)
    out6 = jax.block_until_ready(out6)
    assert jnp.allclose(out6, ref_f_nomask, atol=5e-4, rtol=5e-4)

    # 7) flash, per-query mask.
    out7 = dot_product_attention(qf, kf, vf,
                                 jnp.broadcast_to(vlf[:, None], (Bf, Qf)),
                                 return_weights=False, tk=128)
    out7 = jax.block_until_ready(out7)
    assert jnp.allclose(out7, ref_f, atol=5e-4, rtol=5e-4)

    print("KERNEL_OK")
</pallas_src>

<mosaic_0001>
module attributes {stable_mosaic.version = 11 : i64} {
  func.func @_kernel_batch_mask(%arg0: i32, %arg1: i32, %arg2: memref<2xi32, #tpu.memory_space<smem>>, %arg3: memref<1x8x32xf32, #tpu.memory_space<vmem>>, %arg4: memref<1x8x32xf32, #tpu.memory_space<vmem>>, %arg5: memref<1x8x32xf32, #tpu.memory_space<vmem>>, %arg6: memref<1x8x32xf32, #tpu.memory_space<vmem>>, %arg7: memref<1x8x8xf32, #tpu.memory_space<vmem>>) attributes {dimension_semantics = [#tpu.dimension_semantics<parallel>, #tpu.dimension_semantics<parallel>], iteration_bounds = array<i64: 2, 1>, scalar_prefetch = 1 : i64, scratch_operands = 0 : i64, tpu.core_type = #tpu.core_type<tc>, window_params = [{transform_indices = @transform_0, window_bounds = array<i64: 1, 8, 32>}, {transform_indices = @transform_1, window_bounds = array<i64: 1, 8, 32>}, {transform_indices = @transform_2, window_bounds = array<i64: 1, 8, 32>}, {transform_indices = @transform_3, window_bounds = array<i64: 1, 8, 32>}, {transform_indices = @transform_4, window_bounds = array<i64: 1, 8, 8>}]} {
    %0 = arith.index_cast %arg0 : i32 to index
    %1 = memref.load %arg2[%0] : memref<2xi32, #tpu.memory_space<smem>>
    %c0 = arith.constant 0 : index
    %c0_0 = arith.constant 0 : index
    %c0_1 = arith.constant 0 : index
    %2 = vector.load %arg3[%c0, %c0_0, %c0_1] : memref<1x8x32xf32, #tpu.memory_space<vmem>>, vector<1x8x32xf32>
    %3 = vector.shape_cast %2 : vector<1x8x32xf32> to vector<8x32xf32>
    %c0_2 = arith.constant 0 : index
    %c0_3 = arith.constant 0 : index
    %c0_4 = arith.constant 0 : index
    %4 = vector.load %arg4[%c0_2, %c0_3, %c0_4] : memref<1x8x32xf32, #tpu.memory_space<vmem>>, vector<1x8x32xf32>
    %5 = vector.shape_cast %4 : vector<1x8x32xf32> to vector<8x32xf32>
    %c0_5 = arith.constant 0 : index
    %c0_6 = arith.constant 0 : index
    %c0_7 = arith.constant 0 : index
    %6 = vector.load %arg5[%c0_5, %c0_6, %c0_7] : memref<1x8x32xf32, #tpu.memory_space<vmem>>, vector<1x8x32xf32>
    %7 = vector.shape_cast %6 : vector<1x8x32xf32> to vector<8x32xf32>
    %cst = arith.constant 0.176776692 : f32
    %8 = vector.broadcast %cst : f32 to vector<8x32xf32>
    %9 = arith.mulf %3, %8 : vector<8x32xf32>
    %cst_8 = arith.constant dense<0.000000e+00> : vector<8x8xf32>
    %10 = tpu.matmul %9, %5, %cst_8 {dimension_numbers = #tpu.dot_dimension_numbers<[1], [1], [0], [0], [0, 0, 1, 0], [], []>} : vector<8x32xf32>, vector<8x32xf32>, vector<8x8xf32> -> vector<8x8xf32>
    %11 = tpu.iota {dimensions = array<i32: 1>} : vector<1x8xi32>
    %12 = vector.broadcast %1 : i32 to vector<1x8xi32>
    %13 = arith.cmpi slt, %11, %12 : vector<1x8xi32>
    %cst_9 = arith.constant -1.000000e+06 : f32
    %14 = vector.shape_cast %13 : vector<1x8xi1> to vector<1x8xi1>
    %15 = vector.broadcast %14 : vector<1x8xi1> to vector<8x8xi1>
    %16 = vector.broadcast %cst_9 : f32 to vector<8x8xf32>
    %17 = arith.select %15, %10, %16 : vector<8x8xi1>, vector<8x8xf32>
    %cst_10 = arith.constant dense<0xFF800000> : vector<8xf32>
    %18 = vector.multi_reduction <maximumf>, %17, %cst_10 [1] : vector<8x8xf32> to vector<8xf32>
    %19 = vector.shape_cast %18 : vector<8xf32> to vector<8x1xf32>
    %20 = vector.broadcast %19 : vector<8x1xf32> to vector<8x8xf32>
    %21 = arith.subf %17, %20 : vector<8x8xf32>
    %22 = math.exp %21 : vector<8x8xf32>
    %cst_11 = arith.constant dense<0.000000e+00> : vector<8xf32>
    %23 = vector.multi_reduction <add>, %22, %cst_11 [1] : vector<8x8xf32> to vector<8xf32>
    %24 = vector.shape_cast %23 : vector<8xf32> to vector<8x1xf32>
    %25 = tpu.reciprocal %24 {approx = true} : vector<8x1xf32> -> vector<8x1xf32>
    %26 = arith.mulf %24, %25 : vector<8x1xf32>
    %cst_12 = arith.constant 2.000000e+00 : f32
    %27 = vector.broadcast %cst_12 : f32 to vector<8x1xf32>
    %28 = arith.subf %27, %26 : vector<8x1xf32>
    %29 = arith.mulf %25, %28 : vector<8x1xf32>
    %30 = vector.broadcast %29 : vector<8x1xf32> to vector<8x8xf32>
    %31 = arith.mulf %22, %30 : vector<8x8xf32>
    %c0_13 = arith.constant 0 : index
    %c0_14 = arith.constant 0 : index
    %c0_15 = arith.constant 0 : index
    %32 = vector.load %arg7[%c0_13, %c0_14, %c0_15] : memref<1x8x8xf32, #tpu.memory_space<vmem>>, vector<1x8x8xf32>
    %33 = vector.shape_cast %32 : vector<1x8x8xf32> to vector<8x8xf32>
    %34 = vector.shape_cast %31 : vector<8x8xf32> to vector<1x8x8xf32>
    tpu.vector_store %arg7[%c0_13, %c0_14, %c0_15], %34 {strides = array<i32>} : memref<1x8x8xf32, #tpu.memory_space<vmem>>, vector<1x8x8xf32>,
    %cst_16 = arith.constant dense<0.000000e+00> : vector<8x32xf32>
    %35 = tpu.matmul %22, %7, %cst_16 {dimension_numbers = #tpu.dot_dimension_numbers<[1], [0], [0], [1], [0, 0, 1, 1], [], []>} : vector<8x8xf32>, vector<8x32xf32>, vector<8x32xf32> -> vector<8x32xf32>
    %36 = vector.broadcast %29 : vector<8x1xf32> to vector<8x32xf32>
    %37 = arith.mulf %35, %36 : vector<8x32xf32>
    %c0_17 = arith.constant 0 : index
    %c0_18 = arith.constant 0 : index
    %c0_19 = arith.constant 0 : index
    %38 = vector.load %arg6[%c0_17, %c0_18, %c0_19] : memref<1x8x32xf32, #tpu.memory_space<vmem>>, vector<1x8x32xf32>
    %39 = vector.shape_cast %38 : vector<1x8x32xf32> to vector<8x32xf32>
    %40 = vector.shape_cast %37 : vector<8x32xf32> to vector<1x8x32xf32>
    tpu.vector_store %arg6[%c0_17, %c0_18, %c0_19], %40 {strides = array<i32>} : memref<1x8x32xf32, #tpu.memory_space<vmem>>, vector<1x8x32xf32>,
    return
  }
  func.func @transform_0(%arg0: i32, %arg1: i32, %arg2: memref<2xi32, #tpu.memory_space<smem>>) -> (i32, i32, i32) {
    %c0_i32 = arith.constant 0 : i32
    %c0_i32_0 = arith.constant 0 : i32
    return %arg0, %arg1, %c0_i32 : i32, i32, i32
  }
  func.func @transform_1(%arg0: i32, %arg1: i32, %arg2: memref<2xi32, #tpu.memory_space<smem>>) -> (i32, i32, i32) {
    %c0_i32 = arith.constant 0 : i32
    %c0_i32_0 = arith.constant 0 : i32
    %c0_i32_1 = arith.constant 0 : i32
    return %arg0, %c0_i32, %c0_i32_0 : i32, i32, i32
  }
  func.func @transform_2(%arg0: i32, %arg1: i32, %arg2: memref<2xi32, #tpu.memory_space<smem>>) -> (i32, i32, i32) {
    %c0_i32 = arith.constant 0 : i32
    %c0_i32_0 = arith.constant 0 : i32
    %c0_i32_1 = arith.constant 0 : i32
    return %arg0, %c0_i32, %c0_i32_0 : i32, i32, i32
  }
  func.func @transform_3(%arg0: i32, %arg1: i32, %arg2: memref<2xi32, #tpu.memory_space<smem>>) -> (i32, i32, i32) {
    %c0_i32 = arith.constant 0 : i32
    %c0_i32_0 = arith.constant 0 : i32
    return %arg0, %arg1, %c0_i32 : i32, i32, i32
  }
  func.func @transform_4(%arg0: i32, %arg1: i32, %arg2: memref<2xi32, #tpu.memory_space<smem>>) -> (i32, i32, i32) {
    %c0_i32 = arith.constant 0 : i32
    %c0_i32_0 = arith.constant 0 : i32
    return %arg0, %arg1, %c0_i32 : i32, i32, i32
  }
}

</mosaic_0001>

<bundles_post_ra>
// kernel: tpu_custom_call.1
= control target key start
LH: loop header
LB: loop body
LE: loop exit
PB: predicated region body
PF: predicated region fallthrough
CT: control target
= control target key end

     0   :  { %s1390_s0 = inlined_call_operand.hbm [shape: s32[2], index: 0, kind: input, shape index: {}]   ;;  %s1391_s1 = inlined_call_operand.hbm [shape: f32[2,8,32], index: 1, kind: input, shape index: {}]   ;;  %s1392_s2 = inlined_call_operand.hbm [shape: f32[2,8,32], index: 2, kind: input, shape index: {}]   ;;  %s1393_s3 = inlined_call_operand.hbm [shape: f32[2,8,32], index: 3, kind: input, shape index: {}]   ;;  %s1394_s4 = inlined_call_operand.hbm [shape: f32[2,8,32], index: 4, kind: output, shape index: {0}]   ;;  %s1395_s5 = inlined_call_operand.hbm [shape: f32[2,8,8], index: 5, kind: output, shape index: {1}]  }
   0x1   :  { %1404 = sst [smem:[#allocation22_spill]] %s1392_s2  ;;  %s812_s20 = scalar_lea.hbm %s1390_s0, 16 }
   0x2   :  { %p813_p0 = scmp.ne.s32.totalorder %s1390_s0, %s812_s20  ;;  %p816_p1 = scmp.lt.u32.totalorder %s812_s20, %s1390_s0 }
   0x4   :  { %p818_p2 = pnand %p816_p1, %p813_p0 }
   0x6   :  { %821 = shalt.err (!%p818_p2)  }
   0x7   :  { %s1034_s25 = smov [#allocation3]  }
   0x8   :  { %12 = dma.hbm_to_smem %s1390_s0, 16, %s1034_s25, [#allocation2] }
   0x9   :  { %992 = dma.done.wait [#allocation2], 16 }
   0xa   :  { %993 = vsyncadd [#allocation2], 4294967280 }
   0xb   :  { %14 = sfence }
   0xc   :  { %15 = vsyncpa [#allocation5], 0 }
   0xd   :  { %17 = vsyncpa [#allocation5 + $0x1], 0 }
   0xe   :  { %18 = vsyncpa [#allocation8], 0 }
   0xf   :  { %20 = vsyncpa [#allocation8 + $0x1], 0 }
  0x10   :  { %21 = vsyncpa [#allocation6], 0 }
  0x11   :  { %23 = vsyncpa [#allocation6 + $0x1], 0 }
  0x12   :  { %24 = vsyncpa [#allocation12], 0 }
  0x13   :  { %26 = vsyncpa [#allocation12 + $0x1], 0  ;;  %s1084_s28 = smov 0   ;;  %s1086_s29 = smov 0  }
  0x14   :  { %s1088_s30 = smov 0   ;;  %s1090_s6 = smov 0  }
  0x15   :  { %s1092_s0 = smov 0   ;;  %s1094_s7 = smov 0  }
  0x16 LB: > { %1405 = sst [smem:[#allocation18_spill]] %s1028_s0  ;;  %s1115_s8 = sadd.s32 4294967295, %s1032_s7   ;;  %s1032_s7 = sphi %s1094_s7, %s32_s7   ;;  %s1028_s0 = sphi %s1092_s0, %s1429_s0   ;;  %s1024_s6 = sphi %s1090_s6, %s1428_s6   ;;  %s1020_s30 = sphi %s1088_s30, %s1432_s30   ;;  %s1016_s29 = sphi %s1086_s29, %s1431_s29   ;;  %s1012_s28 = sphi %s1084_s28, %s1430_s28  }
  0x17   : > { %1406 = sst [smem:[#allocation19_spill]] %s1032_s7  ;;  %s690_s9 = sadd.s32 4294967294, %s1032_s7  }
  0x18   : > { %s44_s10 = sadd.s32 1, %s1028_s0  ;;  %s53_s11 = sadd.s32 1, %s1020_s30 }
  0x19   : > { %p46_p3 = scmp.ge.s32.totalorder %s44_s10, 2  ;;  %p60_p4 = scmp.ne.s32.totalorder %s1020_s30, %s1016_s29 }
  0x1a   : > { %p61_p5 = scmp.eq.s32.totalorder %s1032_s7, 0  ;;  %p66_p6 = scmp.ne.s32.totalorder %s1016_s29, %s1012_s28 }
  0x1b   : > { %s1434_s10 = smov (%p46_p3, %s44_s10), 0  ;;  %p67_p8 = scmp.eq.s32.totalorder %s1115_s8, 0 }
  0x1c   : > { %1407 = sst [smem:[#allocation20_spill]] %s1434_s10  ;;  %p1127_p7 = por %p61_p5, %p60_p4 }
  0x1d   : > { %s48_s13 = ssub.s32 %s1028_s0, %s1434_s10  ;;  %p144_p9 = scmp.eq.s32.totalorder %s1115_s8, 1 }
  0x1e   : > { %p51_p10 = scmp.eq.s32.totalorder %s48_s13, 0  ;;  %p1135_p11 = por %p67_p8, %p66_p6 }
  0x1f   : > { %p1139_p12 = por %p144_p9, %p60_p4  ;;  %p150_p13 = scmp.eq.s32.totalorder %s690_s9, 1 }
  0x20   : > { %s1409_s14 = scalar_select %p1135_p11, 1, 0 }
  0x21   : > { %s1410_s15 = scalar_select %p1139_p12, 1, 0 }
  0x22   : > { %s1144_s16 = scalar_select %p51_p10, %s1020_s30, %s53_s11  }
  0x23   : > { %p1146_p0 = por %p150_p13, %p66_p6  ;;  %p755_p2 = scmp.lt.s32.totalorder %s1032_s7, 2 }
  0x24   : > { %1411 = sst [smem:[#allocation21_spill]] %s1144_s16  ;;  %s1396_s18 = sand.u32 1, %s1020_s30  }
  0x25   : > { %s1412_s17 = scalar_select %p1146_p0, 1, 0 }
  0x26   : > { %s1155_s19 = sshll.u32 %s1396_s18, 3  ;;  %s1158_s20 = sshll.u32 %s1028_s0, 7 }
  0x27   : > { %p1162_p3 = pnand %p755_p2, %p1127_p7  ;;  %s217_s22 = sand.u32 1, %s1032_s7  }
  0x28   : > { %s1414_s2 = sld [smem:[#allocation22_spill]]  ;;  %s221_s26 = scalar_lea.vmem [#allocation7], %s1155_s19 }
  0x29   : > { %s1413_s21 = scalar_select %p1162_p3, 1, 0 }
  0x2a   : > { %s228_s27 = sshll.u32 %s221_s26, 4  ;;  %s1178_s9 = scalar_lea.sflag [#allocation8], %s217_s22  ;;  %s1175_s27 = int_to_ptr.vmem [resolvable:$true] %s228_s27 }
  0x2b   : > { %p1184_p7 = pneg %p1162_p3 }
  0x2e   : > { %s1171_s25 = scalar_lea.hbm %s1414_s2, %s1158_s20  ;;  %s827_s24 = scalar_lea.hbm %s1414_s2, 256 }
  0x2f   : > { %s822_s11 = scalar_lea.hbm %s1171_s25, 128  ;;  %p828_p10 = scmp.lt.u32.totalorder %s1171_s25, %s1414_s2 }
  0x30   : > { %p823_p6 = scmp.ne.s32.totalorder %s1171_s25, %s822_s11  ;;  %p829_p13 = scmp.lt.u32.totalorder %s827_s24, %s822_s11 }
  0x31   : > { %p831_p1 = scmp.lt.u32.totalorder %s822_s11, %s1171_s25 }
  0x32   : > { %p825_p8 = pnand %p1184_p7, %p823_p6  ;;  %p830_p2 = por %p829_p13, %p828_p10 }
  0x34   : > { %p826_p9 = pneg %p825_p8  ;;  %p832_p4 = por %p831_p1, %p830_p2 }
  0x36   : > { %p833_p5 = pnand %p832_p4, %p826_p9 }
  0x38   : > { %836 = shalt.err (!%p833_p5)
}
  0x39   : > { %s837_s22 = scalar_lea.vmem %s1175_s27, 128  ;;  %s1035_s13 = smov [#allocation7]  }
  0x3a   : > { %p838_p6 = scmp.ne.s32.totalorder %s1175_s27, %s837_s22  ;;  %s842_s23 = sshll.u32 %s1035_s13, 4  ;;  %s843_s23 = int_to_ptr.vmem [resolvable:$false] %s842_s23 }
  0x3b   : > { %s844_s18 = scalar_lea.vmem %s843_s23, 256  ;;  %p845_p12 = scmp.lt.s32.totalorder %s1175_s27, %s843_s23 }
  0x3c   : > { %p840_p8 = pnand %p838_p6, %p1184_p7  ;;  %p846_p11 = scmp.lt.s32.totalorder %s844_s18, %s837_s22 }
  0x3e   : > { %p841_p0 = pneg %p840_p8  ;;  %p847_p10 = por %p846_p11, %p845_p12 }
  0x40   : > { %p848_p13 = pnand %p847_p10, %p841_p0 }
  0x42   : > { %851 = shalt.err (!%p848_p13)
}
  0x43   : > { %744 = dma.hbm_to_vmem [thread:$0]  (!%p1162_p3), %s1171_s25, 128, %s1175_s27, %s1178_s9  }
  0x44   : > { %p1416_p1 = scmp.lt.s32.totalorder %s1032_s7, 3  ;;  %p1417_p4 = scmp.ge.s32.totalorder %s1032_s7, 1 }
  0x45   : > { %s1220_s22 = scalar_lea.hbm %s1391_s1, %s1158_s20  ;;  %s202_s13 = scalar_lea.vmem [#allocation4], %s1155_s19 }
  0x46   : > { %p1212_p5 = pnand %p1417_p4, %p1416_p1  ;;  %s210_s23 = sshll.u32 %s202_s13, 4  ;;  %s1223_s23 = int_to_ptr.vmem [resolvable:$true] %s210_s23 }
  0x47   : > { %s1229_s18 = scalar_lea.hbm %s1393_s3, %s1158_s20  ;;  %s1419_s2 = sand.u32 1, %s1020_s30  }
  0x48   : > { %s1418_s11 = scalar_select %p1212_p5, 1, 0 }
  0x49   : > { %s199_s10 = scalar_lea.sflag [#allocation5], %s1419_s2  ;;  %s852_s0 = scalar_lea.hbm %s1220_s22, 128 }
  0x4a   : > { %p853_p11 = scmp.ne.s32.totalorder %s1220_s22, %s852_s0  ;;  %s857_s16 = scalar_lea.hbm %s1391_s1, 256 }
  0x4b   : > { %p858_p9 = scmp.lt.u32.totalorder %s1220_s22, %s1391_s1  ;;  %p859_p2 = scmp.lt.u32.totalorder %s857_s16, %s852_s0 }
  0x4c   : > { %p855_p12 = pnand %p853_p11, %p1184_p7  ;;  %p861_p8 = scmp.lt.u32.totalorder %s852_s0, %s1220_s22 }
  0x4d   : > { %p860_p6 = por %p859_p2, %p858_p9 }
  0x4e   : > { %p856_p0 = pneg %p855_p12 }
  0x4f   : > { %p862_p10 = por %p861_p8, %p860_p6 }
  0x51   : > { %p863_p13 = pnand %p862_p10, %p856_p0 }
  0x53   : > { %866 = shalt.err (!%p863_p13)
}
  0x54   : > { %s867_s2 = scalar_lea.vmem %s1223_s23, 128  ;;  %s1036_s20 = smov [#allocation4]  }
  0x55   : > { %p868_p1 = scmp.ne.s32.totalorder %s1223_s23, %s867_s2  ;;  %s872_s25 = sshll.u32 %s1036_s20, 4  ;;  %s873_s25 = int_to_ptr.vmem [resolvable:$false] %s872_s25 }
  0x56   : > { %s874_s7 = scalar_lea.vmem %s873_s25, 256  ;;  %p875_p12 = scmp.lt.s32.totalorder %s1223_s23, %s873_s25 }
  0x57   : > { %p870_p4 = pnand %p868_p1, %p1184_p7  ;;  %p876_p5 = scmp.lt.s32.totalorder %s874_s7, %s867_s2 }
  0x59   : > { %p871_p11 = pneg %p870_p4  ;;  %p877_p9 = por %p876_p5, %p875_p12 }
  0x5b   : > { %p878_p2 = pnand %p877_p9, %p871_p11 }
  0x5d   : > { %881 = shalt.err (!%p878_p2)
}
  0x5e   : > { %741 = dma.hbm_to_vmem [thread:$0]  (!%p1162_p3), %s1220_s22, 128, %s1223_s23, %s199_s10  }
  0x5f   : > { %s239_s0 = scalar_lea.vmem [#allocation9], %s1155_s19  ;;  %s882_s27 = scalar_lea.hbm %s1229_s18, 128 }
  0x60   : > { %s246_s16 = sshll.u32 %s239_s0, 4  ;;  %p883_p0 = scmp.ne.s32.totalorder %s1229_s18, %s882_s27  ;;  %s247_s16 = int_to_ptr.vmem [resolvable:$true] %s246_s16 }
  0x61   : > { %s887_s13 = scalar_lea.hbm %s1393_s3, 256  ;;  %p888_p8 = scmp.lt.u32.totalorder %s1229_s18, %s1393_s3 }
  0x62   : > { %p885_p5 = pnand %p883_p0, %p1184_p7  ;;  %p889_p10 = scmp.lt.u32.totalorder %s887_s13, %s882_s27 }
  0x63   : > { %p891_p1 = scmp.lt.u32.totalorder %s882_s27, %s1229_s18 }
  0x64   : > { %p886_p6 = pneg %p885_p5  ;;  %p890_p13 = por %p889_p10, %p888_p8 }
  0x66   : > { %p892_p4 = por %p891_p1, %p890_p13 }
  0x68   : > { %p893_p11 = pnand %p892_p4, %p886_p6 }
  0x6a   : > { %896 = shalt.err (!%p893_p11)
}
  0x6b   : > { %s897_s10 = scalar_lea.vmem %s247_s16, 128  ;;  %s1037_s19 = smov [#allocation9]  }
  0x6c   : > { %p898_p12 = scmp.ne.s32.totalorder %s247_s16, %s897_s10  ;;  %s902_s22 = sshll.u32 %s1037_s19, 4  ;;  %s903_s22 = int_to_ptr.vmem [resolvable:$false] %s902_s22 }
  0x6d   : > { %s904_s23 = scalar_lea.vmem %s903_s22, 256  ;;  %p905_p0 = scmp.lt.s32.totalorder %s247_s16, %s903_s22 }
  0x6e   : > { %p900_p9 = pnand %p898_p12, %p1184_p7  ;;  %p906_p5 = scmp.lt.s32.totalorder %s904_s23, %s897_s10 }
  0x70   : > { %p901_p2 = pneg %p900_p9  ;;  %p907_p3 = por %p906_p5, %p905_p0 }
  0x72   : > { %p908_p8 = pnand %p907_p3, %p901_p2 }
  0x74   : > { %911 = shalt.err (!%p908_p8)
}
  0x75   : > { %p1420_p10 = scmp.ne.s32.totalorder %s1413_s21, 0  ;;  %p1421_p6 = scmp.ne.s32.totalorder %s1418_s11, 0 }
  0x76   : > { %s1276_s12 = sand.u32 (!%p1421_p6), 1, %s1016_s29   ;;  %p1422_p3 = scmp.ne.s32.totalorder (!%p1421_p6), %s1409_s14, 0 }
  0x77   : > { %747 = dma.hbm_to_vmem [thread:$0]  (!%p1420_p10), %s1229_s18, 128, %s247_s16, %s1178_s9  }
  0x78   : > { %255 = sbr.rel (%p1421_p6) target bundleno = 736 (0x2e0), region = 32  ;;  %s1279_s25 = sshll.u32 (!%p1421_p6), %s1276_s12, 3 }
  0x79   : > { %s258_s7 = scalar_lea.sflag (!%p1421_p6), [#allocation5], %s1276_s12  ;;  %s261_s0 = scalar_lea.vmem (!%p1421_p6), [#allocation4], %s1279_s25 }
  0x7f   : > { %995 = dma.done.wait (%p1422_p3), %s258_s7, 128  }
  0x80   : > { %997 = vsyncadd (%p1422_p3), %s258_s7, 4294967168  ;;  %s266_s21 = sand.u32 1, %s1115_s8   ;;  %s270_s11 = scalar_lea.vmem [#allocation7], %s1279_s25 }
  0x81   : > { %s267_s9 = scalar_lea.sflag [#allocation8], %s266_s21 }
  0x82   : > { %999 = dma.done.wait (%p1422_p3), %s267_s9, 256  }
  0x83   : > { %1001 = vsyncadd (%p1422_p3), %s267_s9, 4294967040  ;;  %v1038_v0 = vmov 0.0   ;;  %vm1039_vm0 = vmmov 0   ;;  %vm324_vm1 = vcmask 261120   ;;  %v321_v1 = vld [vmem:[%s270_s11] sm:$0xff]  ;;  %v320_v2 = vld [vmem:[%s261_s0] sm:$0xff]  ;;  %v401_v4 = vlaneseq }
  0x84   : > { %718 = vmatprep.subr.mxu0 %v1038_v0  ;;  %720 = vmatprep.mubr.msk.f32.mxu0 %vm1039_vm0, %v1038_v0  ;;  %v323_v3 = vmul.f32 0.17677669, %v320_v2  ;;  %s319_s8 = sld [smem:[#allocation3 + %s1024_s6]]  ;;  %vm408_vm3 = vcmask 64512   ;;  %s279_s14 = scalar_lea.vmem [#allocation9], %s1279_s25 }
  0x85   : > { %723 = vmatprep.subr.mxu1 %v1038_v0  ;;  %725 = vmatprep.mubr.msk.f32.mxu1 %vm1039_vm0, %v1038_v0  ;;  %v402_v5 = vand.u32 127, %v401_v4  ;;  %v322_v11 = vld [vmem:[%s279_s14] sm:$0xff]  ;;  %s710_s18 = sshll.u32 %s1024_s6, 7  ;;  %s318_s16 = scalar_lea.vmem [#allocation11], %s1279_s25 }
  0x86   : > { %719 = vmatpush3.xpose.msk.msra.mxu0 %vm324_vm1, %v321_v1  ;;  %724 = vmatpush3.msra.mxu1 %v322_v11  ;;  %s533_s27 = sshll.u32 %s318_s16, 4  ;;  %s1307_s13 = scalar_lea.hbm %s1395_s5, %s710_s18  ;;  %s1309_s27 = int_to_ptr.vmem [resolvable:$true] %s533_s27 }
  0x87   : > { %s505_s2 = scalar_lea.sflag [#allocation12], %s1276_s12  ;;  %s912_s20 = scalar_lea.vmem %s1309_s27, 128 }
  0x88   : > { %p913_p7 = scmp.ne.s32.totalorder %s1309_s27, %s912_s20  ;;  %p1423_p13 = scmp.ne.s32.totalorder %s1410_s15, 0 }
  0x89   : > { %721 = vmatmul.mubr.msk.f32.vlgmr.msra.gmra.mrb[0].mxu0 %vm324_vm1, %v323_v3  ;;  %s1040_s10 = smov [#allocation11]  }
  0x8a   : > { %v403_v6 = vstv %s319_s8  ;;  %p914_p1 = pnand %p913_p7, %p1423_p13  ;;  %s916_s19 = sshll.u32 %s1040_s10, 4  ;;  %s917_s19 = int_to_ptr.vmem [resolvable:$false] %s916_s19 }
  0x8b   : > { %vm404_vm2 = vcmp.lt.s32.totalorder %v402_v5, %v403_v6  ;;  %s918_s22 = scalar_lea.vmem %s917_s19, 256  ;;  %p919_p11 = scmp.lt.s32.totalorder %s1309_s27, %s917_s19 }
  0x8c   : > { %p915_p4 = pneg %p914_p1  ;;  %p920_p12 = scmp.lt.s32.totalorder %s918_s22, %s912_s20 }
  0x8e   : > { %p921_p9 = por %p920_p12, %p919_p11 }
  0x90   : > { %p922_p2 = pnand %p921_p9, %p915_p4 }
 0x15c   : > { %v397_v7 = vpop.f32.mrb[0].mxu0 }
 0x15d   : > { %v407_v8 = vsel %vm404_vm2, %v397_v7, -1000000.0  ;;  %v722_v9 = vpop.f32.mrb[1].mxu0 }
 0x15e   : > { %v409_v10 = vsel %vm408_vm3, %v407_v8, -inf }
 0x15f   : > { %410 = vmax.xlane.f32.xlu0 %v409_v10 }
 0x1ec   : > { %v411_v12 = vpop.xlane.xlu0 %410 }
 0x1ed   : > { %v412_v13 = vsub.f32 %v407_v8, %v411_v12 }
 0x1ef   : > { %v413_v14 = vmul.f32 1.442695, %v412_v13 }
 0x1f1   : > { %808 = vpow2.f32 %v413_v14 }
 0x1fb   : > { %v809_v15 = vpop.eup %808 }
 0x1fc   : > { %726 = vmatmul.mubr.msk.f32.vlgmr.msra.gmra.mrb[0].mxu1 %vm408_vm3, %v809_v15  ;;  %v415_v16 = vsel %vm408_vm3, %v809_v15, 0.0 }
 0x1fd   : > { %416 = vadd.xlane.f32.xlu0 %v415_v16 }
 0x28a   : > { %v417_v17 = vpop.xlane.xlu0 %416 }
 0x28b   : > { %810 = vrcp.f32 %v417_v17 }
 0x295   : > { %v811_v18 = vpop.eup %810 }
 0x296   : > { %v419_v19 = vmul.f32 %v811_v18, %v417_v17 }
 0x298   : > { %v420_v20 = vsub.f32 2.0, %v419_v19 }
 0x29a   : > { %v421_v21 = vmul.f32 %v811_v18, %v420_v20 }
 0x29c   : > { %v422_v22 = vmul.f32 %v809_v15, %v421_v21 }
 0x29e   : > { %423 = vst.msk [vmem:[%s318_s16] sm:$0xff] %vm408_vm3, %v422_v22 }
 0x29f   : > { %925 = shalt.err (!%p922_p2)
}
 0x2a0   : > { %s926_s23 = scalar_lea.hbm %s1307_s13, 128  ;;  %s930_s21 = scalar_lea.hbm %s1395_s5, 256 }
 0x2a1   : > { %p927_p0 = scmp.ne.s32.totalorder %s1307_s13, %s926_s23  ;;  %p931_p10 = scmp.lt.u32.totalorder %s1307_s13, %s1395_s5 }
 0x2a2   : > { %p932_p6 = scmp.lt.u32.totalorder %s930_s21, %s926_s23  ;;  %p934_p7 = scmp.lt.u32.totalorder %s926_s23, %s1307_s13 }
 0x2a3   : > { %p928_p5 = pnand %p927_p0, %p1423_p13 }
 0x2a4   : > { %p933_p3 = por %p932_p6, %p931_p10 }
 0x2a5   : > { %p929_p8 = pneg %p928_p5 }
 0x2a6   : > { %p935_p1 = por %p934_p7, %p933_p3 }
 0x2a8   : > { %p936_p4 = pnand %p935_p1, %p929_p8 }
 0x2aa   : > { %939 = shalt.err (!%p936_p4)
}
 0x2ab   : > { %735 = dma.vmem_to_hbm [thread:$0]  (%p1423_p13), %s1309_s27, 128, %s1307_s13, %s505_s2  }
 0x2ac   : > { %s311_s8 = scalar_lea.vmem [#allocation10], %s1279_s25  ;;  %s1340_s26 = scalar_lea.hbm %s1394_s4, %s710_s18 }
 0x2ad   : > { %s519_s14 = sshll.u32 %s311_s8, 4  ;;  %s500_s20 = scalar_lea.sflag [#allocation6], %s1276_s12  ;;  %s1342_s14 = int_to_ptr.vmem [resolvable:$true] %s519_s14 }
 0x2ae   : > { %s940_s27 = scalar_lea.vmem %s1342_s14, 128  ;;  %s1041_s25 = smov [#allocation10]  }
 0x2af   : > { %p941_p11 = scmp.ne.s32.totalorder %s1342_s14, %s940_s27  ;;  %s944_s6 = sshll.u32 %s1041_s25, 4  ;;  %s945_s6 = int_to_ptr.vmem [resolvable:$false] %s944_s6 }
 0x2b0   : > { %s946_s13 = scalar_lea.vmem %s945_s6, 256  ;;  %p947_p2 = scmp.lt.s32.totalorder %s1342_s14, %s945_s6 }
 0x2b1   : > { %p942_p12 = pnand %p941_p11, %p1423_p13  ;;  %p948_p0 = scmp.lt.s32.totalorder %s946_s13, %s940_s27 }
 0x2b3   : > { %p943_p9 = pneg %p942_p12  ;;  %p949_p5 = por %p948_p0, %p947_p2 }
 0x2b5   : > { %p950_p8 = pnand %p949_p5, %p943_p9 }
 0x2cf   : > { %v493_v23 = vpop.f32.mrb[0].mxu1 }
 0x2d0   : > { %v497_v24 = vmul.f32 %v493_v23, %v421_v21  ;;  %v727_v25 = vpop.f32.mrb[1].mxu1 }
 0x2d2   : > { %498 = vst.msk [vmem:[%s311_s8] sm:$0xff] %vm324_vm1, %v497_v24 }
 0x2d3   : > { %953 = shalt.err (!%p950_p8)
}
 0x2d4   : > { %s954_s12 = scalar_lea.hbm %s1340_s26, 128  ;;  %s958_s10 = scalar_lea.hbm %s1394_s4, 256 }
 0x2d5   : > { %p955_p10 = scmp.ne.s32.totalorder %s1340_s26, %s954_s12  ;;  %p959_p7 = scmp.lt.u32.totalorder %s1340_s26, %s1394_s4 }
 0x2d6   : > { %p960_p1 = scmp.lt.u32.totalorder %s958_s10, %s954_s12  ;;  %p962_p11 = scmp.lt.u32.totalorder %s954_s12, %s1340_s26 }
 0x2d7   : > { %p956_p6 = pnand %p955_p10, %p1423_p13 }
 0x2d8   : > { %p961_p4 = por %p960_p1, %p959_p7 }
 0x2d9   : > { %p957_p3 = pneg %p956_p6 }
 0x2da   : > { %p963_p12 = por %p962_p11, %p961_p4 }
 0x2dc   : > { %p964_p9 = pnand %p963_p12, %p957_p3 }
 0x2de   : > { %967 = shalt.err (!%p964_p9)
}
 0x2df   : > { %734 = dma.vmem_to_hbm [thread:$0]  (%p1423_p13), %s1342_s14, 128, %s1340_s26, %s500_s20  }
 0x2e0 PF: > { %s1424_s23 = sld [smem:[#allocation19_spill]]  ;;  %s545_s7 = sand.u32 1, %s1012_s28  }
 0x2e1   : > { %p1425_p2 = scmp.ne.s32.totalorder %s1412_s17, 0  ;;  %s546_s0 = scalar_lea.sflag [#allocation6], %s545_s7 }
 0x2e6   : > { %p1426_p0 = scmp.ge.s32.totalorder %s1424_s23, 2 }
 0x2e8   : > { %p749_p5 = pnand %p1426_p0, %p1425_p2 }
 0x2ea   : > { %1003 = dma.done.wait (!%p749_p5), %s546_s0, 128  }
 0x2eb   : > { %1005 = vsyncadd (!%p749_p5), %s546_s0, 4294967168  ;;  %s555_s21 = scalar_lea.sflag [#allocation12], %s545_s7 }
 0x2ec   : > { %1007 = dma.done.wait (!%p749_p5), %s555_s21, 128  }
 0x2ed   : > { %1009 = vsyncadd (!%p749_p5), %s555_s21, 4294967168  ;;  %s32_s7 = sadd.s32 1, %s1424_s23   ;;  %s1427_s15 = sld [smem:[#allocation21_spill]] }
 0x2ee   : > { %p29_p8 = scmp.ge.s32.totalorder %s32_s7, 4   ;;  %s1428_s6 = sld [smem:[#allocation18_spill]] }
 0x2ef   : > { %s1429_s0 = sld [smem:[#allocation20_spill]]  ;;  %s1430_s28 = smov %s1016_s29 }
 0x2f0   : > { %s1431_s29 = smov %s1020_s30  ;;  %31 = sbr.rel (!%p29_p8) target bundleno = 22 (0x16), region = 118 }
 0x2f3   : > { %s1432_s30 = smov %s1427_s15 }
 0x2f7   :  { %560 = vsyncpa [#allocation5], 1 }
 0x2f8   :  { %562 = vsyncpa [#allocation5 + $0x1], 1 }
 0x2f9   :  { %563 = vsyncpa [#allocation8], 1 }
 0x2fa   :  { %565 = vsyncpa [#allocation8 + $0x1], 1 }
 0x2fb   :  { %566 = vsyncpa [#allocation6], 1 }
 0x2fc   :  { %568 = vsyncpa [#allocation6 + $0x1], 1 }
 0x2fd   :  { %569 = vsyncpa [#allocation12], 1 }
 0x2fe   :  { %571 = vsyncpa [#allocation12 + $0x1], 1 }

</bundles_post_ra>
